<compile_context>
chip_gen: v6e
topology: v6e:2x2x1
jax: 0.10.0
libtpu: 0.0.40
codegen_flags: <defaults>
</compile_context>

<pallas_src>
import jax
import jax.numpy as jnp
from jax import lax
from jax.experimental import pallas as pl
from jax.experimental.pallas import tpu as pltpu


def _dsconv_kernel(x_ref, w_ref, b_ref, o_ref):
    # x_ref: (Nb, H+2, W*Cin)   input rows with a 1-row zero halo along H (wrapper pad)
    # w_ref: (3, W*Cin, W*Cout) banded weights (kw taps + 1x1 + W padding folded in)
    # b_ref: (1, W*Cout)        fused bias, tiled over W
    # o_ref: (Nb*H, W*Cout)     lane-dense output slab
    nb, hp2, k = x_ref.shape
    h = hp2 - 2

    def tap(kh):
        # TODO(synk): kh=1,2 slices start at non-sublane-aligned offsets; if the bundle
        # shows relayout copies, switch to a pre-shifted LHS layout / lane rolls.
        lhs = x_ref[:, pl.ds(kh, h), :].reshape(nb * h, k)
        return jnp.dot(lhs, w_ref[kh], preferred_element_type=jnp.float32)

    # Single fused expression: no VMEM-resident accumulator, one unmasked store.
    o_ref[...] = (tap(0) + tap(1) + tap(2) + b_ref[...]).astype(o_ref.dtype)


def _largest_divisor_leq(n, cap):
    d = int(max(1, min(n, cap)))
    while n % d:
        d -= 1
    return d


def _pick_batch_block(n, per_img_bytes, fixed_bytes, budget_bytes, min_steps=4):
    """Largest divisor of n that fits VMEM, leaves >= min_steps grid steps (so the
    pipeline can prefetch/writeback behind compute) and, when possible, an even
    step count (v7x megacore sharding)."""
    avail = max(budget_bytes - fixed_bytes, per_img_bytes)
    cap = min(avail // per_img_bytes, max(1, n // min_steps))
    nb = _largest_divisor_leq(n, cap)
    if (n // nb) % 2 and n % 2 == 0:
        d = nb
        while d > 1 and (n % d or (n // d) % 2):
            d -= 1
        if n % d == 0 and (n // d) % 2 == 0:
            nb = d
    return nb


def depthwise_separable_conv(x_nchw, dw_w, dw_b, pw_w, pw_b, stride=1,
                             compute_dtype=jnp.float32):
    """x_nchw: (N, Cin, H, W). dw_w: (Cin, 1, 3, 3), dw_b: (Cin,),
    pw_w: (Cout, Cin, 1, 1), pw_b: (Cout,). Returns (N, Cout, H, W)."""
    if stride != 1:
        # TODO(synk): strided depthwise path not implemented (module default stride=1).
        raise NotImplementedError("stride != 1 not supported")
    N, Cin, H, W = x_nchw.shape
    Cout = pw_w.shape[0]
    K, Ncols = W * Cin, W * Cout

    # NCHW -> rows (N, H, W*Cin) with a 1-row zero halo along H (one wrapper pass;
    # the W halo is encoded as zeros in the banded weights).
    # TODO(synk): if the surrounding graph can keep activations in this rows/NHWC
    # layout, drop this transpose and the output one -- each is a full HBM pass.
    x_rows = jnp.transpose(x_nchw, (0, 2, 3, 1)).reshape(N, H, K)
    x_pad = jnp.pad(x_rows, ((0, 0), (1, 1), (0, 0))).astype(compute_dtype)

    # Fold depthwise * pointwise into per-tap weights wtap[kh, kw, ci, co].
    dw_k = dw_w[:, 0, :, :]                                   # (Cin, 3, 3)
    pw_mat = jnp.transpose(pw_w[:, :, 0, 0], (1, 0))          # (Cin, Cout)
    wtap = (jnp.transpose(dw_k, (1, 2, 0))[:, :, :, None]
            * pw_mat[None, None, :, :])                       # (3, 3, Cin, Cout)

    # Banded RHS per kh: R[kh, wi*Cin+ci, wo*Cout+co] = wtap[kh, wi-wo+1, ci, co]
    # for |wi - wo| <= 1, else 0 (zero padding along W implicit).
    # TODO(synk): band is only 3/W dense -- for large W, tile W in the grid (with a
    # +-1 column halo) or switch kw taps to +-Cin lane rolls to avoid O(W^2) weights.
    w_in = jnp.arange(W)[:, None]
    w_out = jnp.arange(W)[None, :]
    kw_idx = w_in - w_out + 1
    valid = ((kw_idx >= 0) & (kw_idx <= 2)).astype(wtap.dtype)
    kw_safe = jnp.clip(kw_idx, 0, 2)
    band = wtap[:, kw_safe] * valid[None, :, :, None, None]   # (3, Wi, Wo, Cin, Cout)
    w_band = jnp.transpose(band, (0, 1, 3, 2, 4)).reshape(3, K, Ncols)
    w_band = w_band.astype(compute_dtype)

    # Fused bias (always f32; added after the f32 accumulation).
    b_fused = dw_b @ pw_mat + pw_b                            # (Cout,)
    b_tiled = jnp.tile(b_fused, (W,)).reshape(1, Ncols).astype(jnp.float32)

    # Block sizing from real VMEM capacity, including the (single-buffered) weights.
    try:
        vmem_cap = int(pltpu.get_tpu_info().vmem_capacity_bytes)
    except Exception:
        vmem_cap = 64 << 20
    in_isz = jnp.dtype(compute_dtype).itemsize
    out_isz = jnp.dtype(x_nchw.dtype).itemsize
    fixed_bytes = in_isz * 3 * K * Ncols + 4 * Ncols                 # weights + bias
    per_img = 2 * in_isz * (H + 2) * K + 2 * out_isz * H * Ncols     # double-buffered
    Nb = _pick_batch_block(N, per_img, fixed_bytes, vmem_cap // 4)
    grid = (N // Nb,)
    footprint = fixed_bytes + Nb * per_img
    vmem_limit = int(min(vmem_cap, max(2 * footprint, 32 << 20)))

    def call(single_buffer_consts):
        if single_buffer_consts:
            # Constant block index across the grid -> one VMEM buffer is enough.
            w_spec = pl.BlockSpec((3, K, Ncols), lambda n: (0, 0, 0),
                                  pipeline_mode=pl.Buffered(1))
            b_spec = pl.BlockSpec((1, Ncols), lambda n: (0, 0),
                                  pipeline_mode=pl.Buffered(1))
        else:
            w_spec = pl.BlockSpec((3, K, Ncols), lambda n: (0, 0, 0))
            b_spec = pl.BlockSpec((1, Ncols), lambda n: (0, 0))
        return pl.pallas_call(
            _dsconv_kernel,
            out_shape=jax.ShapeDtypeStruct((N * H, Ncols), x_nchw.dtype),
            grid_spec=pltpu.PrefetchScalarGridSpec(
                num_scalar_prefetch=0,
                grid=grid,
                in_specs=[pl.BlockSpec((Nb, H + 2, K), lambda n: (n, 0, 0)),
                          w_spec, b_spec],
                out_specs=pl.BlockSpec((Nb * H, Ncols), lambda n: (n, 0)),
            ),
            compiler_params=pltpu.CompilerParams(
                dimension_semantics=("parallel",),
                vmem_limit_bytes=vmem_limit),
        )(x_pad, w_band, b_tiled)

    try:
        out2d = call(True)
    except Exception:
        # pl.Buffered(1) / pipeline_mode unsupported on this jax version: fall back
        # to default double buffering (only costs a second copy of the weight slab).
        out2d = call(False)

    return jnp.transpose(out2d.reshape(N, H, W, Cout), (0, 3, 1, 2))


def _reference(x, dw_w, dw_b, pw_w, pw_b):
    """Pure-JAX NCHW reference matching PyTorch semantics."""
    y = lax.conv_general_dilated(
        x, dw_w, window_strides=(1, 1), padding=((1, 1), (1, 1)),
        dimension_numbers=("NCHW", "OIHW", "NCHW"),
        feature_group_count=x.shape[1])
    y = y + dw_b[None, :, None, None]
    z = lax.conv_general_dilated(
        y, pw_w, window_strides=(1, 1), padding=((0, 0), (0, 0)),
        dimension_numbers=("NCHW", "OIHW", "NCHW"))
    z = z + pw_b[None, :, None, None]
    return z


if __name__ == "__main__":
    key = jax.random.PRNGKey(0)
    k_x, k_dw, k_dwb, k_pw, k_pwb = jax.random.split(key, 5)

    N, Cin, Cout, H, W = 2, 4, 8, 16, 16

    x = jax.random.normal(k_x, (N, Cin, H, W), jnp.float32)
    # PyTorch shapes: Conv2d(Cin, Cin, 3, padding=1, groups=Cin) and Conv2d(Cin, Cout, 1).
    dw_w = jax.random.normal(k_dw, (Cin, 1, 3, 3), jnp.float32) * 0.2
    dw_b = jax.random.normal(k_dwb, (Cin,), jnp.float32) * 0.1
    pw_w = jax.random.normal(k_pw, (Cout, Cin, 1, 1), jnp.float32) * 0.2
    pw_b = jax.random.normal(k_pwb, (Cout,), jnp.float32) * 0.1

    out = depthwise_separable_conv(x, dw_w, dw_b, pw_w, pw_b, stride=1)
    out = jax.block_until_ready(out)

    ref = _reference(x, dw_w, dw_b, pw_w, pw_b)
    assert out.shape == (N, Cout, H, W), out.shape
    err = float(jnp.max(jnp.abs(out - ref)))
    assert jnp.allclose(out, ref, atol=1e-4, rtol=1e-4), err
    print("KERNEL_OK")
</pallas_src>

<mosaic_0001>
module attributes {stable_mosaic.version = 11 : i64} {
  func.func @_dsconv_kernel(%arg0: i32, %arg1: memref<1x18x64xf32, #tpu.memory_space<vmem>>, %arg2: memref<3x64x128xf32, #tpu.memory_space<vmem>>, %arg3: memref<1x128xf32, #tpu.memory_space<vmem>>, %arg4: memref<16x128xf32, #tpu.memory_space<vmem>>) attributes {dimension_semantics = [#tpu.dimension_semantics<parallel>], iteration_bounds = array<i64: 2>, scalar_prefetch = 0 : i64, scratch_operands = 0 : i64, tpu.core_type = #tpu.core_type<tc>, window_params = [{transform_indices = @transform_0, window_bounds = array<i64: 1, 18, 64>}, {pipeline_mode = #tpu.pipeline_mode<synchronous>, transform_indices = @transform_1, window_bounds = array<i64: 3, 64, 128>}, {pipeline_mode = #tpu.pipeline_mode<synchronous>, transform_indices = @transform_2, window_bounds = array<i64: 1, 128>}, {transform_indices = @transform_3, window_bounds = array<i64: 16, 128>}]} {
    %c0 = arith.constant 0 : index
    %c0_0 = arith.constant 0 : index
    %c0_1 = arith.constant 0 : index
    %0 = vector.load %arg1[%c0, %c0_0, %c0_1] : memref<1x18x64xf32, #tpu.memory_space<vmem>>, vector<1x16x64xf32>
    %1 = vector.shape_cast %0 : vector<1x16x64xf32> to vector<16x64xf32>
    %c0_2 = arith.constant 0 : index
    %c0_3 = arith.constant 0 : index
    %c0_4 = arith.constant 0 : index
    %2 = vector.load %arg2[%c0_2, %c0_3, %c0_4] : memref<3x64x128xf32, #tpu.memory_space<vmem>>, vector<1x64x128xf32>
    %3 = vector.shape_cast %2 : vector<1x64x128xf32> to vector<64x128xf32>
    %cst = arith.constant dense<0.000000e+00> : vector<16x128xf32>
    %4 = tpu.matmul %1, %3, %cst {dimension_numbers = #tpu.dot_dimension_numbers<[1], [0], [0], [1], [0, 0, 1, 1], [], []>} : vector<16x64xf32>, vector<64x128xf32>, vector<16x128xf32> -> vector<16x128xf32>
    %c0_5 = arith.constant 0 : index
    %c1 = arith.constant 1 : index
    %c0_6 = arith.constant 0 : index
    %5 = vector.load %arg1[%c0_5, %c1, %c0_6] : memref<1x18x64xf32, #tpu.memory_space<vmem>>, vector<1x16x64xf32>
    %6 = vector.shape_cast %5 : vector<1x16x64xf32> to vector<16x64xf32>
    %c1_7 = arith.constant 1 : index
    %c0_8 = arith.constant 0 : index
    %c0_9 = arith.constant 0 : index
    %7 = vector.load %arg2[%c1_7, %c0_8, %c0_9] : memref<3x64x128xf32, #tpu.memory_space<vmem>>, vector<1x64x128xf32>
    %8 = vector.shape_cast %7 : vector<1x64x128xf32> to vector<64x128xf32>
    %cst_10 = arith.constant dense<0.000000e+00> : vector<16x128xf32>
    %9 = tpu.matmul %6, %8, %cst_10 {dimension_numbers = #tpu.dot_dimension_numbers<[1], [0], [0], [1], [0, 0, 1, 1], [], []>} : vector<16x64xf32>, vector<64x128xf32>, vector<16x128xf32> -> vector<16x128xf32>
    %10 = arith.addf %4, %9 : vector<16x128xf32>
    %c0_11 = arith.constant 0 : index
    %c2 = arith.constant 2 : index
    %c0_12 = arith.constant 0 : index
    %11 = vector.load %arg1[%c0_11, %c2, %c0_12] : memref<1x18x64xf32, #tpu.memory_space<vmem>>, vector<1x16x64xf32>
    %12 = vector.shape_cast %11 : vector<1x16x64xf32> to vector<16x64xf32>
    %c2_13 = arith.constant 2 : index
    %c0_14 = arith.constant 0 : index
    %c0_15 = arith.constant 0 : index
    %13 = vector.load %arg2[%c2_13, %c0_14, %c0_15] : memref<3x64x128xf32, #tpu.memory_space<vmem>>, vector<1x64x128xf32>
    %14 = vector.shape_cast %13 : vector<1x64x128xf32> to vector<64x128xf32>
    %cst_16 = arith.constant dense<0.000000e+00> : vector<16x128xf32>
    %15 = tpu.matmul %12, %14, %cst_16 {dimension_numbers = #tpu.dot_dimension_numbers<[1], [0], [0], [1], [0, 0, 1, 1], [], []>} : vector<16x64xf32>, vector<64x128xf32>, vector<16x128xf32> -> vector<16x128xf32>
    %16 = arith.addf %10, %15 : vector<16x128xf32>
    %c0_17 = arith.constant 0 : index
    %c0_18 = arith.constant 0 : index
    %17 = vector.load %arg3[%c0_17, %c0_18] : memref<1x128xf32, #tpu.memory_space<vmem>>, vector<1x128xf32>
    %18 = vector.broadcast %17 : vector<1x128xf32> to vector<16x128xf32>
    %19 = arith.addf %16, %18 : vector<16x128xf32>
    %c0_19 = arith.constant 0 : index
    %c0_20 = arith.constant 0 : index
    %20 = vector.load %arg4[%c0_19, %c0_20] : memref<16x128xf32, #tpu.memory_space<vmem>>, vector<16x128xf32>
    tpu.vector_store %arg4[%c0_19, %c0_20], %19 {strides = array<i32>} : memref<16x128xf32, #tpu.memory_space<vmem>>, vector<16x128xf32>,
    return
  }
  func.func @transform_0(%arg0: i32) -> (i32, i32, i32) {
    %c0_i32 = arith.constant 0 : i32
    %c0_i32_0 = arith.constant 0 : i32
    %c0_i32_1 = arith.constant 0 : i32
    return %arg0, %c0_i32, %c0_i32_0 : i32, i32, i32
  }
  func.func @transform_1(%arg0: i32) -> (i32, i32, i32) {
    %c0_i32 = arith.constant 0 : i32
    %c0_i32_0 = arith.constant 0 : i32
    %c0_i32_1 = arith.constant 0 : i32
    %c0_i32_2 = arith.constant 0 : i32
    return %c0_i32, %c0_i32_0, %c0_i32_1 : i32, i32, i32
  }
  func.func @transform_2(%arg0: i32) -> (i32, i32) {
    %c0_i32 = arith.constant 0 : i32
    %c0_i32_0 = arith.constant 0 : i32
    %c0_i32_1 = arith.constant 0 : i32
    return %c0_i32, %c0_i32_0 : i32, i32
  }
  func.func @transform_3(%arg0: i32) -> (i32, i32) {
    %c0_i32 = arith.constant 0 : i32
    %c0_i32_0 = arith.constant 0 : i32
    return %arg0, %c0_i32 : i32, i32
  }
}

module attributes {stable_mosaic.version = 11 : i64} {
  func.func @_dsconv_kernel(%arg0: i32, %arg1: memref<1x18x64xf32, #tpu.memory_space<vmem>>, %arg2: memref<3x64x128xf32, #tpu.memory_space<vmem>>, %arg3: memref<1x128xf32, #tpu.memory_space<vmem>>, %arg4: memref<16x128xf32, #tpu.memory_space<vmem>>) attributes {dimension_semantics = [#tpu.dimension_semantics<parallel>], iteration_bounds = array<i64: 2>, scalar_prefetch = 0 : i64, scratch_operands = 0 : i64, tpu.core_type = #tpu.core_type<tc>, window_params = [{transform_indices = @transform_0, window_bounds = array<i64: 1, 18, 64>}, {pipeline_mode = #tpu.pipeline_mode<synchronous>, transform_indices = @transform_1, window_bounds = array<i64: 3, 64, 128>}, {pipeline_mode = #tpu.pipeline_mode<synchronous>, transform_indices = @transform_2, window_bounds = array<i64: 1, 128>}, {transform_indices = @transform_3, window_bounds = array<i64: 16, 128>}]} {
    %c0 = arith.constant 0 : index
    %c0_0 = arith.constant 0 : index
    %c0_1 = arith.constant 0 : index
    %0 = vector.load %arg1[%c0, %c0_0, %c0_1] : memref<1x18x64xf32, #tpu.memory_space<vmem>>, vector<1x16x64xf32>
    %1 = vector.shape_cast %0 : vector<1x16x64xf32> to vector<16x64xf32>
    %c0_2 = arith.constant 0 : index
    %c0_3 = arith.constant 0 : index
    %c0_4 = arith.constant 0 : index
    %2 = vector.load %arg2[%c0_2, %c0_3, %c0_4] : memref<3x64x128xf32, #tpu.memory_space<vmem>>, vector<1x64x128xf32>
    %3 = vector.shape_cast %2 : vector<1x64x128xf32> to vector<64x128xf32>
    %cst = arith.constant dense<0.000000e+00> : vector<16x128xf32>
    %4 = tpu.matmul %1, %3, %cst {dimension_numbers = #tpu.dot_dimension_numbers<[1], [0], [0], [1], [0, 0, 1, 1], [], []>} : vector<16x64xf32>, vector<64x128xf32>, vector<16x128xf32> -> vector<16x128xf32>
    %c0_5 = arith.constant 0 : index
    %c1 = arith.constant 1 : index
    %c0_6 = arith.constant 0 : index
    %5 = vector.load %arg1[%c0_5, %c1, %c0_6] : memref<1x18x64xf32, #tpu.memory_space<vmem>>, vector<1x16x64xf32>
    %6 = vector.shape_cast %5 : vector<1x16x64xf32> to vector<16x64xf32>
    %c1_7 = arith.constant 1 : index
    %c0_8 = arith.constant 0 : index
    %c0_9 = arith.constant 0 : index
    %7 = vector.load %arg2[%c1_7, %c0_8, %c0_9] : memref<3x64x128xf32, #tpu.memory_space<vmem>>, vector<1x64x128xf32>
    %8 = vector.shape_cast %7 : vector<1x64x128xf32> to vector<64x128xf32>
    %cst_10 = arith.constant dense<0.000000e+00> : vector<16x128xf32>
    %9 = tpu.matmul %6, %8, %cst_10 {dimension_numbers = #tpu.dot_dimension_numbers<[1], [0], [0], [1], [0, 0, 1, 1], [], []>} : vector<16x64xf32>, vector<64x128xf32>, vector<16x128xf32> -> vector<16x128xf32>
    %10 = arith.addf %4, %9 : vector<16x128xf32>
    %c0_11 = arith.constant 0 : index
    %c2 = arith.constant 2 : index
    %c0_12 = arith.constant 0 : index
    %11 = vector.load %arg1[%c0_11, %c2, %c0_12] : memref<1x18x64xf32, #tpu.memory_space<vmem>>, vector<1x16x64xf32>
    %12 = vector.shape_cast %11 : vector<1x16x64xf32> to vector<16x64xf32>
    %c2_13 = arith.constant 2 : index
    %c0_14 = arith.constant 0 : index
    %c0_15 = arith.constant 0 : index
    %13 = vector.load %arg2[%c2_13, %c0_14, %c0_15] : memref<3x64x128xf32, #tpu.memory_space<vmem>>, vector<1x64x128xf32>
    %14 = vector.shape_cast %13 : vector<1x64x128xf32> to vector<64x128xf32>
    %cst_16 = arith.constant dense<0.000000e+00> : vector<16x128xf32>
    %15 = tpu.matmul %12, %14, %cst_16 {dimension_numbers = #tpu.dot_dimension_numbers<[1], [0], [0], [1], [0, 0, 1, 1], [], []>} : vector<16x64xf32>, vector<64x128xf32>, vector<16x128xf32> -> vector<16x128xf32>
    %16 = arith.addf %10, %15 : vector<16x128xf32>
    %c0_17 = arith.constant 0 : index
    %c0_18 = arith.constant 0 : index
    %17 = vector.load %arg3[%c0_17, %c0_18] : memref<1x128xf32, #tpu.memory_space<vmem>>, vector<1x128xf32>
    %18 = vector.broadcast %17 : vector<1x128xf32> to vector<16x128xf32>
    %19 = arith.addf %16, %18 : vector<16x128xf32>
    %c0_19 = arith.constant 0 : index
    %c0_20 = arith.constant 0 : index
    %20 = vector.load %arg4[%c0_19, %c0_20] : memref<16x128xf32, #tpu.memory_space<vmem>>, vector<16x128xf32>
    tpu.vector_store %arg4[%c0_19, %c0_20], %19 {strides = array<i32>} : memref<16x128xf32, #tpu.memory_space<vmem>>, vector<16x128xf32>,
    return
  }
  func.func @transform_0(%arg0: i32) -> (i32, i32, i32) {
    %c0_i32 = arith.constant 0 : i32
    %c0_i32_0 = arith.constant 0 : i32
    %c0_i32_1 = arith.constant 0 : i32
    return %arg0, %c0_i32, %c0_i32_0 : i32, i32, i32
  }
  func.func @transform_1(%arg0: i32) -> (i32, i32, i32) {
    %c0_i32 = arith.constant 0 : i32
    %c0_i32_0 = arith.constant 0 : i32
    %c0_i32_1 = arith.constant 0 : i32
    %c0_i32_2 = arith.constant 0 : i32
    return %c0_i32, %c0_i32_0, %c0_i32_1 : i32, i32, i32
  }
  func.func @transform_2(%arg0: i32) -> (i32, i32) {
    %c0_i32 = arith.constant 0 : i32
    %c0_i32_0 = arith.constant 0 : i32
    %c0_i32_1 = arith.constant 0 : i32
    return %c0_i32, %c0_i32_0 : i32, i32
  }
  func.func @transform_3(%arg0: i32) -> (i32, i32) {
    %c0_i32 = arith.constant 0 : i32
    %c0_i32_0 = arith.constant 0 : i32
    return %arg0, %c0_i32 : i32, i32
  }
}

</mosaic_0001>

<bundles_post_ra>
// kernel: tpu_custom_call.1
= control target key start
LH: loop header
LB: loop body
LE: loop exit
PB: predicated region body
PF: predicated region fallthrough
CT: control target
= control target key end

     0   :  { %8 = vsyncpa [#allocation3], 0  ;;  %s980_s0 = inlined_call_operand.vmem [shape: f32[2,18,64], index: 0, kind: input, shape index: {}]   ;;  %s981_s1 = inlined_call_operand.hbm [shape: f32[3,64,128], index: 1, kind: input, shape index: {}]   ;;  %s982_s2 = inlined_call_operand.vmem [shape: f32[1,128], index: 2, kind: input, shape index: {}]   ;;  %s983_s3 = inlined_call_operand.hbm [shape: f32[32,128], index: 3, kind: output, shape index: {}]  }
   0x1   :  { %9 = vsyncpa [#allocation4], 0 }
   0x2   :  { %11 = vsyncpa [#allocation4 + $0x1], 0  ;;  %s843_s12 = smov 0   ;;  %s845_s13 = smov 0  }
   0x3   :  { %s847_s14 = smov 0   ;;  %s849_s15 = smov 0  }
   0x4 LB: > { %s864_s16 = sadd.s32 4294967295, %s815_s15   ;;  %s562_s17 = sadd.s32 4294967294, %s815_s15   ;;  %s815_s15 = sphi %s849_s15, %s991_s15   ;;  %s811_s14 = sphi %s847_s14, %s990_s14   ;;  %s807_s13 = sphi %s845_s13, %s989_s13   ;;  %s803_s12 = sphi %s843_s12, %s988_s12  }
   0x5   : > { %s868_s18 = sadd.s32 1, %s815_s15   ;;  %s92_s19 = sadd.s32 1, %s811_s14 }
   0x6   : > { %s89_s20 = ssub.s32 %s815_s15, %s868_s18  ;;  %p102_p0 = scmp.ne.s32.totalorder %s811_s14, %s807_s13 }
   0x7   : > { %p90_p1 = scmp.eq.s32.totalorder %s89_s20, 0  ;;  %p103_p2 = scmp.eq.s32.totalorder %s864_s16, 1 }
   0x8   : > { %p108_p3 = scmp.ne.s32.totalorder %s807_s13, %s803_s12  ;;  %p109_p4 = scmp.eq.s32.totalorder %s562_s17, 1 }
   0x9   : > { %s879_s21 = scalar_select %p90_p1, %s811_s14, %s92_s19  }
   0xa   : > { %p881_p5 = por %p103_p2, %p102_p0  ;;  %p885_p6 = por %p109_p4, %p108_p3 }
   0xb   : > { %p563_p7 = scmp.ge.s32.totalorder %s815_s15, 1  ;;  %p116_p8 = scmp.lt.s32.totalorder %s815_s15, 3 }
   0xc   : > { %s985_s23 = scalar_select %p885_p6, 1, 0 }
   0xd   : > { %p685_p9 = scmp.eq.s32.totalorder %s864_s16, 0  ;;  %p892_p10 = pnand %p563_p7, %p116_p8 }
   0xe   : > { %s817_s25 = smov [#allocation2]  }
   0xf   : > { %s128_s26 = sshll.u32 %s817_s25, 4  ;;  %p677_p11 = pneg %p892_p10  ;;  %s129_s26 = int_to_ptr.vmem [resolvable:$true] %s128_s26 }
  0x10   : > { %s736_s27 = scalar_lea.vmem %s129_s26, 3072  ;;  %p744_p3 = scmp.lt.s32.totalorder %s129_s26, %s129_s26 }
  0x11   : > { %p678_p12 = pnand %p685_p9, %p677_p11  ;;  %p737_p0 = scmp.ne.s32.totalorder %s129_s26, %s736_s27 }
  0x12   : > { %p745_p4 = scmp.lt.s32.totalorder %s736_s27, %s736_s27 }
  0x13   : > { %p727_p13 = pneg %p678_p12 }
  0x14   : > { %p746_p6 = por %p745_p4, %p744_p3 }
  0x15   : > { %p739_p1 = pnand %p737_p0, %p727_p13 }
  0x17   : > { %p740_p2 = pneg %p739_p1 }
  0x19   : > { %p747_p7 = pnand %p746_p6, %p740_p2 }
  0x1b   : > { %750 = shalt.err (!%p747_p7)
}
  0x1c   : > { %s818_s28 = smov 128   ;;  %s819_s29 = smov 8  }
  0x1d   : > { %680 = dma.hbm_to_vmem [thread:$0]  (!%p678_p12), %s981_s1, 3072, %s129_s26, [#allocation3], %s818_s28, %s818_s28, %s819_s29  }
  0x1e   : > { %155 = sbr.rel (%p892_p10) target bundleno = 284 (0x11c), region = 32 }
  0x23   : > { %794 = dma.done.wait (%p685_p9), [#allocation3], 3072  }
  0x24   : > { %796 = vsyncadd (%p685_p9), [#allocation3], 4294964224  ;;  %p179_p8 = scmp.lt.s32.totalorder %s864_s16, 1  ;;  %v205_v0 = vld [vmem:[#allocation2 + $0x78] sm:$0xff]  ;;  %v204_v2 = vld [vmem:[#allocation2 + $0x70] sm:$0xff]  ;;  %vm206_vm0 = vcmask 523264  }
  0x25   : > { %v194_v1 = vld [vmem:[#allocation2 + $0x38] sm:$0xff]  ;;  %613 = vmatprep.subr.mxu0 %v205_v0  ;;  %v193_v3 = vld [vmem:[#allocation2 + $0x30] sm:$0xff]  ;;  %v203_v4 = vld [vmem:[#allocation2 + $0x68] sm:$0xff]  ;;  %s176_s10 = sand.u32 1, %s807_s13   ;;  %s582_s25 = sshll.u32 %s864_s16, 8 }
  0x26   : > { %632 = vmatprep.subr.mxu1 %v194_v1  ;;  %614 = vmatpush3.msra.mxu0 %v205_v0  ;;  %v192_v5 = vld [vmem:[#allocation2 + $0x28] sm:$0xff]  ;;  %s180_s5 = scalar_select %p179_p8, %s864_s16, 1  ;;  %v202_v6 = vld [vmem:[#allocation2 + $0x60] sm:$0xff]  ;;  %v201_v8 = vld [vmem:[#allocation2 + $0x58] sm:$0xff] }
  0x27   : > { %633 = vmatpush3.msra.mxu1 %v194_v1  ;;  %615 = vmatprep.subr.mxu0 %v204_v2  ;;  %v191_v7 = vld [vmem:[#allocation2 + $0x20] sm:$0xff]  ;;  %v190_v9 = vld [vmem:[#allocation2 + $0x18] sm:$0xff]  ;;  %v200_v10 = vld [vmem:[#allocation2 + $0x50] sm:$0xff]  ;;  %s568_s11 = sshll.u32 %s176_s10, 4  ;;  %s938_s28 = scalar_lea.hbm %s983_s3, %s582_s25 }
  0x28   : > { %634 = vmatprep.subr.mxu1 %v193_v3  ;;  %616 = vmatpush3.msra.mxu0 %v204_v2  ;;  %s670_s6 = smul.u32 24, %s180_s5  ;;  %v189_v11 = vld [vmem:[#allocation2 + $0x10] sm:$0xff]  ;;  %v199_v12 = vld [vmem:[#allocation2 + $0x48] sm:$0xff]  ;;  %v198_v14 = vld [vmem:[#allocation2 + $0x40] sm:$0xff]  ;;  %s178_s20 = scalar_lea.vmem [#allocation5], %s568_s11 }
  0x29   : > { %635 = vmatpush3.msra.mxu1 %v193_v3  ;;  %617 = vmatprep.subr.mxu0 %v203_v4  ;;  %v188_v13 = vld [vmem:[#allocation2 + $0x8] sm:$0xff]  ;;  %v187_v15 = vld [vmem:[#allocation2] sm:$0xff]  ;;  %v379_v20 = vld [vmem:[#allocation2 + $0xb8] sm:$0xff]  ;;  %s488_s24 = sshll.u32 %s178_s20, 4  ;;  %s940_s29 = scalar_lea.sflag [#allocation4], %s176_s10  ;;  %s933_s24 = int_to_ptr.vmem [resolvable:$true] %s488_s24 }
  0x2a   : > { %636 = vmatprep.subr.mxu1 %v192_v5  ;;  %618 = vmatpush3.msra.mxu0 %v203_v4  ;;  %s914_s9 = scalar_lea.vmem %s980_s0, %s670_s6  ;;  %v378_v22 = vld [vmem:[#allocation2 + $0xb0] sm:$0xff]  ;;  %v377_v23 = vld [vmem:[#allocation2 + $0xa8] sm:$0xff]  ;;  %v376_v24 = vld [vmem:[#allocation2 + $0xa0] sm:$0xff]  ;;  %s751_s30 = scalar_lea.vmem %s933_s24, 256 }
  0x2b   : > { %637 = vmatpush3.msra.mxu1 %v192_v5  ;;  %619 = vmatprep.subr.mxu0 %v202_v6  ;;  %v195_v16 = vld [vmem:[%s914_s9 + $0x1] sm:$0xff]  ;;  %v196_v18 = vld [vmem:[%s914_s9 + $0x9] sm:$0xff]  ;;  %v375_v25 = vld [vmem:[#allocation2 + $0x98] sm:$0xff]  ;;  %p752_p6 = scmp.ne.s32.totalorder %s933_s24, %s751_s30  ;;  %s820_s16 = smov [#allocation5]  }
  0x2c   : > { %638 = vmatprep.subr.mxu1 %v191_v7  ;;  %620 = vmatpush3.msra.mxu0 %v202_v6  ;;  %v185_v17 = vld [vmem:[%s914_s9] sm:$0xff]  ;;  %v186_v19 = vld [vmem:[%s914_s9 + $0x8] sm:$0xff]  ;;  %v374_v26 = vld [vmem:[#allocation2 + $0x90] sm:$0xff]  ;;  %s755_s4 = sshll.u32 %s820_s16, 4  ;;  %s756_s4 = int_to_ptr.vmem [resolvable:$false] %s755_s4 }
  0x2d   : > { %639 = vmatpush3.msra.mxu1 %v191_v7  ;;  %621 = vmatprep.subr.mxu0 %v201_v8  ;;  %v369_v21 = vld [vmem:[%s914_s9 + $0x2] sm:$0xff]  ;;  %v370_v29 = vld [vmem:[%s914_s9 + $0xa] sm:$0xff]  ;;  %v576_v36 = vld [vmem:[%s982_s2] ss:$0 sm:$0xff]  ;;  %p753_p9 = pnand %p752_p6, %p881_p5  ;;  %s757_s5 = scalar_lea.vmem %s756_s4, 512 }
  0x2e   : > { %640 = vmatprep.subr.mxu1 %v190_v9  ;;  %622 = vmatpush3.msra.mxu0 %v201_v8  ;;  %v373_v27 = vld [vmem:[#allocation2 + $0x88] sm:$0xff]  ;;  %v372_v28 = vld [vmem:[#allocation2 + $0x80] sm:$0xff]  ;;  %p758_p11 = scmp.lt.s32.totalorder %s933_s24, %s756_s4  ;;  %p759_p12 = scmp.lt.s32.totalorder %s757_s5, %s751_s30 }
  0x2f   : > { %641 = vmatpush3.msra.mxu1 %v190_v9  ;;  %623 = vmatprep.subr.mxu0 %v200_v10  ;;  %p754_p10 = pneg %p753_p9 }
  0x30   : > { %642 = vmatprep.subr.mxu1 %v189_v11  ;;  %624 = vmatpush3.msra.mxu0 %v200_v10  ;;  %p760_p13 = por %p759_p12, %p758_p11 }
  0x31   : > { %643 = vmatpush3.msra.mxu1 %v189_v11  ;;  %625 = vmatprep.subr.mxu0 %v199_v12 }
  0x32   : > { %644 = vmatprep.subr.mxu1 %v188_v13  ;;  %626 = vmatpush3.msra.mxu0 %v199_v12  ;;  %p761_p0 = pnand %p760_p13, %p754_p10 }
  0x33   : > { %645 = vmatpush3.msra.mxu1 %v188_v13  ;;  %627 = vmatprep.subr.mxu0 %v198_v14 }
  0x34   : > { %646 = vmatprep.subr.mxu1 %v187_v15  ;;  %628 = vmatpush3.msra.mxu0 %v198_v14 }
  0x35   : > { %629 = vmatprep.mubr.msk.f32.mxu0 %vm206_vm0, %v195_v16  ;;  %647 = vmatpush3.msra.mxu1 %v187_v15 }
  0x36   : > { %648 = vmatprep.mubr.msk.f32.mxu1 %vm206_vm0, %v185_v17  ;;  %630 = vmatmul.mubr.msk.f32.vlgmr.msra.gmra.mxu0 %vm206_vm0, %v196_v18 }
  0x37   : > { %649 = vmatmul.mubr.msk.f32.vlgmr.msra.gmra.mxu1 %vm206_vm0, %v186_v19  ;;  %651 = vmatprep.subr.mxu0 %v379_v20 }
  0x38   : > { %667 = vmatprep.mubr.msk.f32.mxu0 %vm206_vm0, %v369_v21  ;;  %652 = vmatpush3.msra.mxu0 %v379_v20 }
  0x39   : > { %653 = vmatprep.subr.mxu0 %v378_v22 }
  0x3a   : > { %654 = vmatpush3.msra.mxu0 %v378_v22 }
  0x3b   : > { %655 = vmatprep.subr.mxu0 %v377_v23 }
  0x3c   : > { %656 = vmatpush3.msra.mxu0 %v377_v23 }
  0x3d   : > { %657 = vmatprep.subr.mxu0 %v376_v24 }
  0x3e   : > { %658 = vmatpush3.msra.mxu0 %v376_v24 }
  0x3f   : > { %659 = vmatprep.subr.mxu0 %v375_v25 }
  0x40   : > { %660 = vmatpush3.msra.mxu0 %v375_v25 }
  0x41   : > { %661 = vmatprep.subr.mxu0 %v374_v26 }
  0x42   : > { %662 = vmatpush3.msra.mxu0 %v374_v26 }
  0x43   : > { %663 = vmatprep.subr.mxu0 %v373_v27 }
  0x44   : > { %664 = vmatpush3.msra.mxu0 %v373_v27 }
  0x45   : > { %665 = vmatprep.subr.mxu0 %v372_v28 }
  0x46   : > { %666 = vmatpush3.msra.mxu0 %v372_v28 }
  0x47   : > { %668 = vmatmul.mubr.msk.f32.vlgmr.msra.gmra.mxu0 %vm206_vm0, %v370_v29 }
  0xf6   : > { %v631_v30 = vpop.f32.mrf.mxu0 }
  0xf7   : > { %v650_v31 = vpop.f32.mrf.mxu1 }
  0xf8   : > { %v279_v32 = vpop.f32.mrf.mxu0  ;;  %v366_v34 = vadd.f32 %v650_v31, %v631_v30 }
  0xf9   : > { %v360_v33 = vpop.f32.mrf.mxu1 }
  0xfa   : > { %v361_v37 = vadd.f32 %v360_v33, %v279_v32 }
 0x107   : > { %v669_v35 = vpop.f32.mrf.mxu0 }
 0x108   : > { %v462_v38 = vadd.f32 %v669_v35, %v366_v34 }
 0x109   : > { %v452_v39 = vpop.f32.mrf.mxu0 }
 0x10a   : > { %v471_v40 = vadd.f32 %v576_v36, %v462_v38  ;;  %v461_v41 = vadd.f32 %v452_v39, %v361_v37 }
 0x10c   : > { %473 = vst [vmem:[%s178_s20 + $0x8] sm:$0xff] %v471_v40  ;;  %v470_v42 = vadd.f32 %v576_v36, %v461_v41 }
 0x10e   : > { %472 = vst [vmem:[%s178_s20] sm:$0xff] %v470_v42 }
 0x10f   : > { %764 = shalt.err (!%p761_p0)
}
 0x110   : > { %s765_s6 = scalar_lea.hbm %s938_s28, 256  ;;  %s769_s9 = scalar_lea.hbm %s983_s3, 512 }
 0x111   : > { %p766_p1 = scmp.ne.s32.totalorder %s938_s28, %s765_s6  ;;  %p770_p4 = scmp.lt.s32.totalorder %s938_s28, %s983_s3 }
 0x112   : > { %p771_p7 = scmp.lt.s32.totalorder %s769_s9, %s765_s6 }
 0x113   : > { %p767_p2 = pnand %p766_p1, %p881_p5 }
 0x114   : > { %p772_p8 = por %p771_p7, %p770_p4 }
 0x115   : > { %p768_p3 = pneg %p767_p2 }
 0x117   : > { %p773_p6 = pnand %p772_p8, %p768_p3 }
 0x119   : > { %776 = shalt.err (!%p773_p6)
}
 0x11a   : > { %s821_s17 = smov 128   ;;  %s822_s19 = smov 8  }
 0x11b   : > { %675 = dma.vmem_to_hbm [thread:$0]  (%p881_p5), %s933_s24, 256, %s938_s28, %s940_s29, %s821_s17, %s821_s17, %s822_s19  }
 0x11c PF: > { %p687_p9 = scmp.ge.s32.totalorder %s815_s15, 2  ;;  %s503_s20 = sand.u32 1, %s803_s12  }
 0x11d   : > { %p987_p10 = scmp.ne.s32.totalorder %s985_s23, 0  ;;  %s504_s25 = scalar_lea.sflag [#allocation4], %s503_s20 }
 0x11f   : > { %p682_p11 = pnand %p687_p9, %p987_p10 }
 0x121   : > { %p683_p12 = pneg %p682_p11 }
 0x123   : > { %798 = dma.done.wait (%p683_p12), %s504_s25, 256  }
 0x124   : > { %800 = vsyncadd (%p683_p12), %s504_s25, 4294967040  ;;  %p14_p13 = scmp.ge.s32.totalorder %s868_s18, 4   ;;  %s988_s12 = smov %s807_s13 }
 0x125   : > { %s989_s13 = smov %s811_s14  ;;  %s990_s14 = smov %s879_s21 }
 0x126   : > { %s991_s15 = smov %s868_s18  ;;  %16 = sbr.rel (!%p14_p13) target bundleno = 4 (0x4), region = 74 }
 0x12b   :  { %509 = vsyncpa [#allocation3], 1 }
 0x12c   :  { %511 = vsyncpa [#allocation3 + $0x1], 1 }
 0x12d   :  { %512 = vsyncpa [#allocation4], 1 }
 0x12e   :  { %514 = vsyncpa [#allocation4 + $0x1], 1 }

// kernel: tpu_custom_call.1
= control target key start
LH: loop header
LB: loop body
LE: loop exit
PB: predicated region body
PF: predicated region fallthrough
CT: control target
= control target key end

     0   :  { %8 = vsyncpa [#allocation3], 0  ;;  %s980_s0 = inlined_call_operand.vmem [shape: f32[2,18,64], index: 0, kind: input, shape index: {}]   ;;  %s981_s1 = inlined_call_operand.hbm [shape: f32[3,64,128], index: 1, kind: input, shape index: {}]   ;;  %s982_s2 = inlined_call_operand.vmem [shape: f32[1,128], index: 2, kind: input, shape index: {}]   ;;  %s983_s3 = inlined_call_operand.hbm [shape: f32[32,128], index: 3, kind: output, shape index: {}]  }
   0x1   :  { %9 = vsyncpa [#allocation4], 0 }
   0x2   :  { %11 = vsyncpa [#allocation4 + $0x1], 0  ;;  %s843_s12 = smov 0   ;;  %s845_s13 = smov 0  }
   0x3   :  { %s847_s14 = smov 0   ;;  %s849_s15 = smov 0  }
   0x4 LB: > { %s864_s16 = sadd.s32 4294967295, %s815_s15   ;;  %s562_s17 = sadd.s32 4294967294, %s815_s15   ;;  %s815_s15 = sphi %s849_s15, %s991_s15   ;;  %s811_s14 = sphi %s847_s14, %s990_s14   ;;  %s807_s13 = sphi %s845_s13, %s989_s13   ;;  %s803_s12 = sphi %s843_s12, %s988_s12  }
   0x5   : > { %s868_s18 = sadd.s32 1, %s815_s15   ;;  %s92_s19 = sadd.s32 1, %s811_s14 }
   0x6   : > { %s89_s20 = ssub.s32 %s815_s15, %s868_s18  ;;  %p102_p0 = scmp.ne.s32.totalorder %s811_s14, %s807_s13 }
   0x7   : > { %p90_p1 = scmp.eq.s32.totalorder %s89_s20, 0  ;;  %p103_p2 = scmp.eq.s32.totalorder %s864_s16, 1 }
   0x8   : > { %p108_p3 = scmp.ne.s32.totalorder %s807_s13, %s803_s12  ;;  %p109_p4 = scmp.eq.s32.totalorder %s562_s17, 1 }
   0x9   : > { %s879_s21 = scalar_select %p90_p1, %s811_s14, %s92_s19  }
   0xa   : > { %p881_p5 = por %p103_p2, %p102_p0  ;;  %p885_p6 = por %p109_p4, %p108_p3 }
   0xb   : > { %p563_p7 = scmp.ge.s32.totalorder %s815_s15, 1  ;;  %p116_p8 = scmp.lt.s32.totalorder %s815_s15, 3 }
   0xc   : > { %s985_s23 = scalar_select %p885_p6, 1, 0 }
   0xd   : > { %p685_p9 = scmp.eq.s32.totalorder %s864_s16, 0  ;;  %p892_p10 = pnand %p563_p7, %p116_p8 }
   0xe   : > { %s817_s25 = smov [#allocation2]  }
   0xf   : > { %s128_s26 = sshll.u32 %s817_s25, 4  ;;  %p677_p11 = pneg %p892_p10  ;;  %s129_s26 = int_to_ptr.vmem [resolvable:$true] %s128_s26 }
  0x10   : > { %s736_s27 = scalar_lea.vmem %s129_s26, 3072  ;;  %p744_p3 = scmp.lt.s32.totalorder %s129_s26, %s129_s26 }
  0x11   : > { %p678_p12 = pnand %p685_p9, %p677_p11  ;;  %p737_p0 = scmp.ne.s32.totalorder %s129_s26, %s736_s27 }
  0x12   : > { %p745_p4 = scmp.lt.s32.totalorder %s736_s27, %s736_s27 }
  0x13   : > { %p727_p13 = pneg %p678_p12 }
  0x14   : > { %p746_p6 = por %p745_p4, %p744_p3 }
  0x15   : > { %p739_p1 = pnand %p737_p0, %p727_p13 }
  0x17   : > { %p740_p2 = pneg %p739_p1 }
  0x19   : > { %p747_p7 = pnand %p746_p6, %p740_p2 }
  0x1b   : > { %750 = shalt.err (!%p747_p7)
}
  0x1c   : > { %s818_s28 = smov 128   ;;  %s819_s29 = smov 8  }
  0x1d   : > { %680 = dma.hbm_to_vmem [thread:$0]  (!%p678_p12), %s981_s1, 3072, %s129_s26, [#allocation3], %s818_s28, %s818_s28, %s819_s29  }
  0x1e   : > { %155 = sbr.rel (%p892_p10) target bundleno = 284 (0x11c), region = 32 }
  0x23   : > { %794 = dma.done.wait (%p685_p9), [#allocation3], 3072  }
  0x24   : > { %796 = vsyncadd (%p685_p9), [#allocation3], 4294964224  ;;  %p179_p8 = scmp.lt.s32.totalorder %s864_s16, 1  ;;  %v205_v0 = vld [vmem:[#allocation2 + $0x78] sm:$0xff]  ;;  %v204_v2 = vld [vmem:[#allocation2 + $0x70] sm:$0xff]  ;;  %vm206_vm0 = vcmask 523264  }
  0x25   : > { %v194_v1 = vld [vmem:[#allocation2 + $0x38] sm:$0xff]  ;;  %613 = vmatprep.subr.mxu0 %v205_v0  ;;  %v193_v3 = vld [vmem:[#allocation2 + $0x30] sm:$0xff]  ;;  %v203_v4 = vld [vmem:[#allocation2 + $0x68] sm:$0xff]  ;;  %s176_s10 = sand.u32 1, %s807_s13   ;;  %s582_s25 = sshll.u32 %s864_s16, 8 }
  0x26   : > { %632 = vmatprep.subr.mxu1 %v194_v1  ;;  %614 = vmatpush3.msra.mxu0 %v205_v0  ;;  %v192_v5 = vld [vmem:[#allocation2 + $0x28] sm:$0xff]  ;;  %s180_s5 = scalar_select %p179_p8, %s864_s16, 1  ;;  %v202_v6 = vld [vmem:[#allocation2 + $0x60] sm:$0xff]  ;;  %v201_v8 = vld [vmem:[#allocation2 + $0x58] sm:$0xff] }
  0x27   : > { %633 = vmatpush3.msra.mxu1 %v194_v1  ;;  %615 = vmatprep.subr.mxu0 %v204_v2  ;;  %v191_v7 = vld [vmem:[#allocation2 + $0x20] sm:$0xff]  ;;  %v190_v9 = vld [vmem:[#allocation2 + $0x18] sm:$0xff]  ;;  %v200_v10 = vld [vmem:[#allocation2 + $0x50] sm:$0xff]  ;;  %s568_s11 = sshll.u32 %s176_s10, 4  ;;  %s938_s28 = scalar_lea.hbm %s983_s3, %s582_s25 }
  0x28   : > { %634 = vmatprep.subr.mxu1 %v193_v3  ;;  %616 = vmatpush3.msra.mxu0 %v204_v2  ;;  %s670_s6 = smul.u32 24, %s180_s5  ;;  %v189_v11 = vld [vmem:[#allocation2 + $0x10] sm:$0xff]  ;;  %v199_v12 = vld [vmem:[#allocation2 + $0x48] sm:$0xff]  ;;  %v198_v14 = vld [vmem:[#allocation2 + $0x40] sm:$0xff]  ;;  %s178_s20 = scalar_lea.vmem [#allocation5], %s568_s11 }
  0x29   : > { %635 = vmatpush3.msra.mxu1 %v193_v3  ;;  %617 = vmatprep.subr.mxu0 %v203_v4  ;;  %v188_v13 = vld [vmem:[#allocation2 + $0x8] sm:$0xff]  ;;  %v187_v15 = vld [vmem:[#allocation2] sm:$0xff]  ;;  %v379_v20 = vld [vmem:[#allocation2 + $0xb8] sm:$0xff]  ;;  %s488_s24 = sshll.u32 %s178_s20, 4  ;;  %s940_s29 = scalar_lea.sflag [#allocation4], %s176_s10  ;;  %s933_s24 = int_to_ptr.vmem [resolvable:$true] %s488_s24 }
  0x2a   : > { %636 = vmatprep.subr.mxu1 %v192_v5  ;;  %618 = vmatpush3.msra.mxu0 %v203_v4  ;;  %s914_s9 = scalar_lea.vmem %s980_s0, %s670_s6  ;;  %v378_v22 = vld [vmem:[#allocation2 + $0xb0] sm:$0xff]  ;;  %v377_v23 = vld [vmem:[#allocation2 + $0xa8] sm:$0xff]  ;;  %v376_v24 = vld [vmem:[#allocation2 + $0xa0] sm:$0xff]  ;;  %s751_s30 = scalar_lea.vmem %s933_s24, 256 }
  0x2b   : > { %637 = vmatpush3.msra.mxu1 %v192_v5  ;;  %619 = vmatprep.subr.mxu0 %v202_v6  ;;  %v195_v16 = vld [vmem:[%s914_s9 + $0x1] sm:$0xff]  ;;  %v196_v18 = vld [vmem:[%s914_s9 + $0x9] sm:$0xff]  ;;  %v375_v25 = vld [vmem:[#allocation2 + $0x98] sm:$0xff]  ;;  %p752_p6 = scmp.ne.s32.totalorder %s933_s24, %s751_s30  ;;  %s820_s16 = smov [#allocation5]  }
  0x2c   : > { %638 = vmatprep.subr.mxu1 %v191_v7  ;;  %620 = vmatpush3.msra.mxu0 %v202_v6  ;;  %v185_v17 = vld [vmem:[%s914_s9] sm:$0xff]  ;;  %v186_v19 = vld [vmem:[%s914_s9 + $0x8] sm:$0xff]  ;;  %v374_v26 = vld [vmem:[#allocation2 + $0x90] sm:$0xff]  ;;  %s755_s4 = sshll.u32 %s820_s16, 4  ;;  %s756_s4 = int_to_ptr.vmem [resolvable:$false] %s755_s4 }
  0x2d   : > { %639 = vmatpush3.msra.mxu1 %v191_v7  ;;  %621 = vmatprep.subr.mxu0 %v201_v8  ;;  %v369_v21 = vld [vmem:[%s914_s9 + $0x2] sm:$0xff]  ;;  %v370_v29 = vld [vmem:[%s914_s9 + $0xa] sm:$0xff]  ;;  %v576_v36 = vld [vmem:[%s982_s2] ss:$0 sm:$0xff]  ;;  %p753_p9 = pnand %p752_p6, %p881_p5  ;;  %s757_s5 = scalar_lea.vmem %s756_s4, 512 }
  0x2e   : > { %640 = vmatprep.subr.mxu1 %v190_v9  ;;  %622 = vmatpush3.msra.mxu0 %v201_v8  ;;  %v373_v27 = vld [vmem:[#allocation2 + $0x88] sm:$0xff]  ;;  %v372_v28 = vld [vmem:[#allocation2 + $0x80] sm:$0xff]  ;;  %p758_p11 = scmp.lt.s32.totalorder %s933_s24, %s756_s4  ;;  %p759_p12 = scmp.lt.s32.totalorder %s757_s5, %s751_s30 }
  0x2f   : > { %641 = vmatpush3.msra.mxu1 %v190_v9  ;;  %623 = vmatprep.subr.mxu0 %v200_v10  ;;  %p754_p10 = pneg %p753_p9 }
  0x30   : > { %642 = vmatprep.subr.mxu1 %v189_v11  ;;  %624 = vmatpush3.msra.mxu0 %v200_v10  ;;  %p760_p13 = por %p759_p12, %p758_p11 }
  0x31   : > { %643 = vmatpush3.msra.mxu1 %v189_v11  ;;  %625 = vmatprep.subr.mxu0 %v199_v12 }
  0x32   : > { %644 = vmatprep.subr.mxu1 %v188_v13  ;;  %626 = vmatpush3.msra.mxu0 %v199_v12  ;;  %p761_p0 = pnand %p760_p13, %p754_p10 }
  0x33   : > { %645 = vmatpush3.msra.mxu1 %v188_v13  ;;  %627 = vmatprep.subr.mxu0 %v198_v14 }
  0x34   : > { %646 = vmatprep.subr.mxu1 %v187_v15  ;;  %628 = vmatpush3.msra.mxu0 %v198_v14 }
  0x35   : > { %629 = vmatprep.mubr.msk.f32.mxu0 %vm206_vm0, %v195_v16  ;;  %647 = vmatpush3.msra.mxu1 %v187_v15 }
  0x36   : > { %648 = vmatprep.mubr.msk.f32.mxu1 %vm206_vm0, %v185_v17  ;;  %630 = vmatmul.mubr.msk.f32.vlgmr.msra.gmra.mxu0 %vm206_vm0, %v196_v18 }
  0x37   : > { %649 = vmatmul.mubr.msk.f32.vlgmr.msra.gmra.mxu1 %vm206_vm0, %v186_v19  ;;  %651 = vmatprep.subr.mxu0 %v379_v20 }
  0x38   : > { %667 = vmatprep.mubr.msk.f32.mxu0 %vm206_vm0, %v369_v21  ;;  %652 = vmatpush3.msra.mxu0 %v379_v20 }
  0x39   : > { %653 = vmatprep.subr.mxu0 %v378_v22 }
  0x3a   : > { %654 = vmatpush3.msra.mxu0 %v378_v22 }
  0x3b   : > { %655 = vmatprep.subr.mxu0 %v377_v23 }
  0x3c   : > { %656 = vmatpush3.msra.mxu0 %v377_v23 }
  0x3d   : > { %657 = vmatprep.subr.mxu0 %v376_v24 }
  0x3e   : > { %658 = vmatpush3.msra.mxu0 %v376_v24 }
  0x3f   : > { %659 = vmatprep.subr.mxu0 %v375_v25 }
  0x40   : > { %660 = vmatpush3.msra.mxu0 %v375_v25 }
  0x41   : > { %661 = vmatprep.subr.mxu0 %v374_v26 }
  0x42   : > { %662 = vmatpush3.msra.mxu0 %v374_v26 }
  0x43   : > { %663 = vmatprep.subr.mxu0 %v373_v27 }
  0x44   : > { %664 = vmatpush3.msra.mxu0 %v373_v27 }
  0x45   : > { %665 = vmatprep.subr.mxu0 %v372_v28 }
  0x46   : > { %666 = vmatpush3.msra.mxu0 %v372_v28 }
  0x47   : > { %668 = vmatmul.mubr.msk.f32.vlgmr.msra.gmra.mxu0 %vm206_vm0, %v370_v29 }
  0xf6   : > { %v631_v30 = vpop.f32.mrf.mxu0 }
  0xf7   : > { %v650_v31 = vpop.f32.mrf.mxu1 }
  0xf8   : > { %v279_v32 = vpop.f32.mrf.mxu0  ;;  %v366_v34 = vadd.f32 %v650_v31, %v631_v30 }
  0xf9   : > { %v360_v33 = vpop.f32.mrf.mxu1 }
  0xfa   : > { %v361_v37 = vadd.f32 %v360_v33, %v279_v32 }
 0x107   : > { %v669_v35 = vpop.f32.mrf.mxu0 }
 0x108   : > { %v462_v38 = vadd.f32 %v669_v35, %v366_v34 }
 0x109   : > { %v452_v39 = vpop.f32.mrf.mxu0 }
 0x10a   : > { %v471_v40 = vadd.f32 %v576_v36, %v462_v38  ;;  %v461_v41 = vadd.f32 %v452_v39, %v361_v37 }
 0x10c   : > { %473 = vst [vmem:[%s178_s20 + $0x8] sm:$0xff] %v471_v40  ;;  %v470_v42 = vadd.f32 %v576_v36, %v461_v41 }
 0x10e   : > { %472 = vst [vmem:[%s178_s20] sm:$0xff] %v470_v42 }
 0x10f   : > { %764 = shalt.err (!%p761_p0)
}
 0x110   : > { %s765_s6 = scalar_lea.hbm %s938_s28, 256  ;;  %s769_s9 = scalar_lea.hbm %s983_s3, 512 }
 0x111   : > { %p766_p1 = scmp.ne.s32.totalorder %s938_s28, %s765_s6  ;;  %p770_p4 = scmp.lt.s32.totalorder %s938_s28, %s983_s3 }
 0x112   : > { %p771_p7 = scmp.lt.s32.totalorder %s769_s9, %s765_s6 }
 0x113   : > { %p767_p2 = pnand %p766_p1, %p881_p5 }
 0x114   : > { %p772_p8 = por %p771_p7, %p770_p4 }
 0x115   : > { %p768_p3 = pneg %p767_p2 }
 0x117   : > { %p773_p6 = pnand %p772_p8, %p768_p3 }
 0x119   : > { %776 = shalt.err (!%p773_p6)
}
 0x11a   : > { %s821_s17 = smov 128   ;;  %s822_s19 = smov 8  }
 0x11b   : > { %675 = dma.vmem_to_hbm [thread:$0]  (%p881_p5), %s933_s24, 256, %s938_s28, %s940_s29, %s821_s17, %s821_s17, %s822_s19  }
 0x11c PF: > { %p687_p9 = scmp.ge.s32.totalorder %s815_s15, 2  ;;  %s503_s20 = sand.u32 1, %s803_s12  }
 0x11d   : > { %p987_p10 = scmp.ne.s32.totalorder %s985_s23, 0  ;;  %s504_s25 = scalar_lea.sflag [#allocation4], %s503_s20 }
 0x11f   : > { %p682_p11 = pnand %p687_p9, %p987_p10 }
 0x121   : > { %p683_p12 = pneg %p682_p11 }
 0x123   : > { %798 = dma.done.wait (%p683_p12), %s504_s25, 256  }
 0x124   : > { %800 = vsyncadd (%p683_p12), %s504_s25, 4294967040  ;;  %p14_p13 = scmp.ge.s32.totalorder %s868_s18, 4   ;;  %s988_s12 = smov %s807_s13 }
 0x125   : > { %s989_s13 = smov %s811_s14  ;;  %s990_s14 = smov %s879_s21 }
 0x126   : > { %s991_s15 = smov %s868_s18  ;;  %16 = sbr.rel (!%p14_p13) target bundleno = 4 (0x4), region = 74 }
 0x12b   :  { %509 = vsyncpa [#allocation3], 1 }
 0x12c   :  { %511 = vsyncpa [#allocation3 + $0x1], 1 }
 0x12d   :  { %512 = vsyncpa [#allocation4], 1 }
 0x12e   :  { %514 = vsyncpa [#allocation4 + $0x1], 1 }

</bundles_post_ra>
